<compile_context>
chip_gen: v7x
topology: tpu7x:2x2x1
jax: 0.10.0
libtpu: 0.0.40
codegen_flags: <defaults>
</compile_context>

<pallas_src>
import functools

import jax
import jax.numpy as jnp
from jax.experimental import pallas as pl
from jax.experimental.pallas import tpu as pltpu


def _round_up(n, m):
    return ((n + m - 1) // m) * m


def _gelu_f32(x, approximate):
    if approximate:
        # Tanh-GELU: transcendental goes to the EUP slot (cheaper), but
        # deviates from torch nn.GELU()'s exact-erf default -> off by default.
        return jax.nn.gelu(x, approximate=True)
    # nn.GELU() default = exact erf formulation; computed in f32.
    return 0.5 * x * (1.0 + jax.lax.erf(x * 0.7071067811865476))


def _vmem_budget_bytes():
    """~85% of this device's per-core VMEM (conservative 64 MiB fallback)."""
    cap = 64 << 20
    try:
        info = pltpu.get_tpu_info()
        cap = int(getattr(info, "vmem_capacity_bytes", cap)) or cap
    except Exception:
        pass
    return int(cap * 0.85)


def _mlp_kernel(x_ref, w1_ref, b1_ref, w2_ref, b2_ref, o_ref, *,
                n_chunks, chunk, approximate):
    # x_ref:  (tm, D_p)        row tile of flattened (batch*tokens, dim)
    # w1_ref: (D_p, MLP_p)     resident (constant index_map, single-buffered)
    # b1_ref: (1, MLP_p)
    # w2_ref: (MLP_p, D_p)     resident
    # b2_ref: (1, D_p)
    x = x_ref[...]
    tm = x.shape[0]
    d_out = o_ref.shape[1]

    acc = jnp.zeros((tm, d_out), jnp.float32)
    # Static (unrolled) loop over mlp_dim chunks: per chunk, matmul1 ->
    # bias+GELU -> matmul2-accumulate. Keeps MXU and VPU/EUP work interleaved
    # and the live f32 hidden down to (tm, chunk).
    for c in range(n_chunks):
        c0 = c * chunk
        h = jnp.dot(x, w1_ref[:, c0:c0 + chunk],
                    preferred_element_type=jnp.float32)
        h = h + b1_ref[:, c0:c0 + chunk].astype(jnp.float32)
        h = _gelu_f32(h, approximate)
        # Cast hidden back to the input dtype so matmul 2 also runs the MXU at
        # full rate (no-op for f32 inputs).
        h = h.astype(x.dtype)
        acc = acc + jnp.dot(h, w2_ref[c0:c0 + chunk, :],
                            preferred_element_type=jnp.float32)

    o_ref[...] = (acc + b2_ref[...].astype(jnp.float32)).astype(o_ref.dtype)


@functools.partial(jax.jit,
                   static_argnames=("approximate", "single_buffer_weights"))
def mlp_block(x, w1, b1, w2, b2, approximate=False, single_buffer_weights=True):
    """x: (B, T, dim) -> (B, T, dim). Hot path (matmuls + GELU) in Pallas."""
    B, T, D = x.shape
    mlp_dim = w1.shape[1]
    rows = B * T
    itemsize = x.dtype.itemsize
    # Sublane packing multiple for the row (second-minor) axis.
    sub = 8 if itemsize == 4 else (16 if itemsize == 2 else 32)

    # ---- Lane-dense padding of the contracted / output dims (exact: padded
    # weight rows/cols and biases are zero, GELU(0)=0). --------------------
    D_p = _round_up(D, 128)
    chunk = min(512, _round_up(mlp_dim, 128))
    MLP_p = _round_up(_round_up(mlp_dim, 128), chunk)
    n_chunks = MLP_p // chunk

    if D_p != D or MLP_p != mlp_dim:
        w1 = jnp.pad(w1, ((0, D_p - D), (0, MLP_p - mlp_dim)))
        w2 = jnp.pad(w2, ((0, MLP_p - mlp_dim), (0, D_p - D)))
        b1 = jnp.pad(b1, ((0, MLP_p - mlp_dim),))
        b2 = jnp.pad(b2, ((0, D_p - D),))
    b1_2 = b1.reshape(1, MLP_p)
    b2_2 = b2.reshape(1, D_p)

    x2 = x.reshape(rows, D)
    if D_p != D:
        x2 = jnp.pad(x2, ((0, 0), (0, D_p - D)))

    # ---- Row tile: largest that fits the per-device VMEM budget. No row
    # padding; the grid handles a ragged trailing block. -------------------
    budget = _vmem_budget_bytes()
    wbuf = 1 if single_buffer_weights else 2
    w_itemsize = w1.dtype.itemsize
    weight_bytes = wbuf * (2 * D_p * MLP_p * w_itemsize
                           + (MLP_p + D_p) * b1.dtype.itemsize)
    headroom = 4 << 20

    def footprint(tm):
        io = 4 * tm * D_p * itemsize           # double-buffered in + out tiles
        hid = tm * chunk * 4 + tm * D_p * 4    # f32 hidden chunk + f32 acc
        return weight_bytes + io + hid + headroom

    max_tm = _round_up(rows, sub)
    tm_eff = sub
    for cand in (512, 256, 128, 64, 32, 16, 8):
        cand = max(cand, sub)
        if cand > max_tm:
            continue
        if footprint(cand) <= budget:
            tm_eff = cand
            break
    tm_eff = min(_round_up(tm_eff, sub), max_tm)
    grid = (pl.cdiv(rows, tm_eff),)

    vmem_limit = int(min(budget, max(footprint(tm_eff), 16 << 20)))

    # Advisory cost estimate so XLA schedules surrounding ops sensibly.
    cost = pl.CostEstimate(
        flops=int(4 * rows * D_p * MLP_p),          # two matmuls
        transcendentals=int(rows * MLP_p),          # erf/tanh in GELU
        bytes_accessed=int(rows * D_p * itemsize * 2
                           + 2 * D_p * MLP_p * w_itemsize
                           + (MLP_p + D_p) * b1.dtype.itemsize))

    # Weights/biases never change across the grid -> constant index_map and
    # (optionally) single buffering to halve their VMEM footprint.
    def _const_spec(shape):
        if single_buffer_weights:
            return pl.BlockSpec(shape, lambda i: (0, 0),
                                pipeline_mode=pl.Buffered(1))
        return pl.BlockSpec(shape, lambda i: (0, 0))

    kernel = functools.partial(_mlp_kernel, n_chunks=n_chunks, chunk=chunk,
                               approximate=approximate)

    out = pl.pallas_call(
        kernel,
        out_shape=jax.ShapeDtypeStruct((rows, D_p), x.dtype),
        grid_spec=pltpu.PrefetchScalarGridSpec(
            num_scalar_prefetch=0,
            grid=grid,
            in_specs=[
                pl.BlockSpec((tm_eff, D_p), lambda i: (i, 0)),   # x row tile
                _const_spec((D_p, MLP_p)),                       # W1 (full)
                _const_spec((1, MLP_p)),                         # b1
                _const_spec((MLP_p, D_p)),                       # W2 (full)
                _const_spec((1, D_p)),                           # b2
            ],
            out_specs=pl.BlockSpec((tm_eff, D_p), lambda i: (i, 0)),
        ),
        compiler_params=pltpu.CompilerParams(
            dimension_semantics=("parallel",),
            vmem_limit_bytes=vmem_limit),
        cost_estimate=cost,
    )(x2, w1, b1_2, w2, b2_2)

    if D_p != D:
        out = out[:, :D]
    return out.reshape(B, T, D)


def _ref_mlp(x, w1, b1, w2, b2):
    h = x @ w1 + b1
    h = 0.5 * h * (1.0 + jax.lax.erf(h * 0.7071067811865476))
    return h @ w2 + b2


if __name__ == "__main__":
    # Small shapes consistent with the module:
    #   batch=2, n_tokens (patches)=8, dim=32, mlp_dim=64
    B, T, D, MLP = 2, 8, 32, 64

    key = jax.random.PRNGKey(0)
    kx, k1, k2, k3, k4 = jax.random.split(key, 5)

    x = jax.random.normal(kx, (B, T, D), dtype=jnp.float32)
    # nn.Linear(D, MLP) / nn.Linear(MLP, D) params, stored transposed (in, out).
    w1 = jax.random.normal(k1, (D, MLP), dtype=jnp.float32) * (1.0 / jnp.sqrt(D))
    b1 = jax.random.normal(k2, (MLP,), dtype=jnp.float32) * 0.01
    w2 = jax.random.normal(k3, (MLP, D), dtype=jnp.float32) * (1.0 / jnp.sqrt(MLP))
    b2 = jax.random.normal(k4, (D,), dtype=jnp.float32) * 0.01

    try:
        out = jax.block_until_ready(mlp_block(x, w1, b1, w2, b2))
    except Exception:
        # Fallback if this jax build rejects single-buffered weight BlockSpecs.
        out = jax.block_until_ready(
            mlp_block(x, w1, b1, w2, b2, single_buffer_weights=False))

    ref = _ref_mlp(x, w1, b1, w2, b2)
    assert out.shape == x.shape
    assert jnp.allclose(out, ref, atol=1e-5, rtol=1e-5), "mismatch vs reference"

    print("KERNEL_OK")
</pallas_src>

<mosaic_0001>
module attributes {stable_mosaic.version = 11 : i64} {
  func.func @_mlp_kernel(%arg0: i32, %arg1: memref<16x128xf32, #tpu.memory_space<vmem>>, %arg2: memref<128x128xf32, #tpu.memory_space<vmem>>, %arg3: memref<1x128xf32, #tpu.memory_space<vmem>>, %arg4: memref<128x128xf32, #tpu.memory_space<vmem>>, %arg5: memref<1x128xf32, #tpu.memory_space<vmem>>, %arg6: memref<16x128xf32, #tpu.memory_space<vmem>>) attributes {dimension_semantics = [#tpu.dimension_semantics<parallel>], iteration_bounds = array<i64: 1>, scalar_prefetch = 0 : i64, scratch_operands = 0 : i64, tpu.core_type = #tpu.core_type<tc>, window_params = [{transform_indices = @transform_0, window_bounds = array<i64: 16, 128>}, {pipeline_mode = #tpu.pipeline_mode<synchronous>, transform_indices = @transform_1, window_bounds = array<i64: 128, 128>}, {pipeline_mode = #tpu.pipeline_mode<synchronous>, transform_indices = @transform_2, window_bounds = array<i64: 1, 128>}, {pipeline_mode = #tpu.pipeline_mode<synchronous>, transform_indices = @transform_3, window_bounds = array<i64: 128, 128>}, {pipeline_mode = #tpu.pipeline_mode<synchronous>, transform_indices = @transform_4, window_bounds = array<i64: 1, 128>}, {transform_indices = @transform_5, window_bounds = array<i64: 16, 128>}]} {
    %c0 = arith.constant 0 : index
    %c0_0 = arith.constant 0 : index
    %0 = vector.load %arg1[%c0, %c0_0] : memref<16x128xf32, #tpu.memory_space<vmem>>, vector<16x128xf32>
    %cst = arith.constant 0.000000e+00 : f32
    %1 = vector.broadcast %cst : f32 to vector<16x128xf32>
    %c0_1 = arith.constant 0 : index
    %c0_2 = arith.constant 0 : index
    %2 = vector.load %arg2[%c0_1, %c0_2] : memref<128x128xf32, #tpu.memory_space<vmem>>, vector<128x128xf32>
    %cst_3 = arith.constant dense<0.000000e+00> : vector<16x128xf32>
    %3 = tpu.matmul %0, %2, %cst_3 {dimension_numbers = #tpu.dot_dimension_numbers<[1], [0], [0], [1], [0, 0, 1, 1], [], []>} : vector<16x128xf32>, vector<128x128xf32>, vector<16x128xf32> -> vector<16x128xf32>
    %c0_4 = arith.constant 0 : index
    %c0_5 = arith.constant 0 : index
    %4 = vector.load %arg3[%c0_4, %c0_5] : memref<1x128xf32, #tpu.memory_space<vmem>>, vector<1x128xf32>
    %5 = vector.broadcast %4 : vector<1x128xf32> to vector<16x128xf32>
    %6 = arith.addf %3, %5 : vector<16x128xf32>
    %cst_6 = arith.constant 5.000000e-01 : f32
    %7 = vector.broadcast %cst_6 : f32 to vector<16x128xf32>
    %8 = arith.mulf %7, %6 : vector<16x128xf32>
    %cst_7 = arith.constant 0.707106769 : f32
    %9 = vector.broadcast %cst_7 : f32 to vector<16x128xf32>
    %10 = arith.mulf %6, %9 : vector<16x128xf32>
    %11 = math.erf %10 : vector<16x128xf32>
    %cst_8 = arith.constant 1.000000e+00 : f32
    %12 = vector.broadcast %cst_8 : f32 to vector<16x128xf32>
    %13 = arith.addf %12, %11 : vector<16x128xf32>
    %14 = arith.mulf %8, %13 : vector<16x128xf32>
    %c0_9 = arith.constant 0 : index
    %c0_10 = arith.constant 0 : index
    %15 = vector.load %arg4[%c0_9, %c0_10] : memref<128x128xf32, #tpu.memory_space<vmem>>, vector<128x128xf32>
    %cst_11 = arith.constant dense<0.000000e+00> : vector<16x128xf32>
    %16 = tpu.matmul %14, %15, %cst_11 {dimension_numbers = #tpu.dot_dimension_numbers<[1], [0], [0], [1], [0, 0, 1, 1], [], []>} : vector<16x128xf32>, vector<128x128xf32>, vector<16x128xf32> -> vector<16x128xf32>
    %17 = arith.addf %1, %16 : vector<16x128xf32>
    %c0_12 = arith.constant 0 : index
    %c0_13 = arith.constant 0 : index
    %18 = vector.load %arg5[%c0_12, %c0_13] : memref<1x128xf32, #tpu.memory_space<vmem>>, vector<1x128xf32>
    %19 = vector.broadcast %18 : vector<1x128xf32> to vector<16x128xf32>
    %20 = arith.addf %17, %19 : vector<16x128xf32>
    %c0_14 = arith.constant 0 : index
    %c0_15 = arith.constant 0 : index
    %21 = vector.load %arg6[%c0_14, %c0_15] : memref<16x128xf32, #tpu.memory_space<vmem>>, vector<16x128xf32>
    tpu.vector_store %arg6[%c0_14, %c0_15], %20 {strides = array<i32>} : memref<16x128xf32, #tpu.memory_space<vmem>>, vector<16x128xf32>,
    return
  }
  func.func @transform_0(%arg0: i32) -> (i32, i32) {
    %c0_i32 = arith.constant 0 : i32
    %c0_i32_0 = arith.constant 0 : i32
    return %arg0, %c0_i32 : i32, i32
  }
  func.func @transform_1(%arg0: i32) -> (i32, i32) {
    %c0_i32 = arith.constant 0 : i32
    %c0_i32_0 = arith.constant 0 : i32
    %c0_i32_1 = arith.constant 0 : i32
    return %c0_i32, %c0_i32_0 : i32, i32
  }
  func.func @transform_2(%arg0: i32) -> (i32, i32) {
    %c0_i32 = arith.constant 0 : i32
    %c0_i32_0 = arith.constant 0 : i32
    %c0_i32_1 = arith.constant 0 : i32
    return %c0_i32, %c0_i32_0 : i32, i32
  }
  func.func @transform_3(%arg0: i32) -> (i32, i32) {
    %c0_i32 = arith.constant 0 : i32
    %c0_i32_0 = arith.constant 0 : i32
    %c0_i32_1 = arith.constant 0 : i32
    return %c0_i32, %c0_i32_0 : i32, i32
  }
  func.func @transform_4(%arg0: i32) -> (i32, i32) {
    %c0_i32 = arith.constant 0 : i32
    %c0_i32_0 = arith.constant 0 : i32
    %c0_i32_1 = arith.constant 0 : i32
    return %c0_i32, %c0_i32_0 : i32, i32
  }
  func.func @transform_5(%arg0: i32) -> (i32, i32) {
    %c0_i32 = arith.constant 0 : i32
    %c0_i32_0 = arith.constant 0 : i32
    return %arg0, %c0_i32 : i32, i32
  }
}

module attributes {stable_mosaic.version = 11 : i64} {
  func.func @_mlp_kernel(%arg0: i32, %arg1: memref<16x128xf32, #tpu.memory_space<vmem>>, %arg2: memref<128x128xf32, #tpu.memory_space<vmem>>, %arg3: memref<1x128xf32, #tpu.memory_space<vmem>>, %arg4: memref<128x128xf32, #tpu.memory_space<vmem>>, %arg5: memref<1x128xf32, #tpu.memory_space<vmem>>, %arg6: memref<16x128xf32, #tpu.memory_space<vmem>>) attributes {dimension_semantics = [#tpu.dimension_semantics<parallel>], iteration_bounds = array<i64: 1>, scalar_prefetch = 0 : i64, scratch_operands = 0 : i64, tpu.core_type = #tpu.core_type<tc>, window_params = [{transform_indices = @transform_0, window_bounds = array<i64: 16, 128>}, {pipeline_mode = #tpu.pipeline_mode<synchronous>, transform_indices = @transform_1, window_bounds = array<i64: 128, 128>}, {pipeline_mode = #tpu.pipeline_mode<synchronous>, transform_indices = @transform_2, window_bounds = array<i64: 1, 128>}, {pipeline_mode = #tpu.pipeline_mode<synchronous>, transform_indices = @transform_3, window_bounds = array<i64: 128, 128>}, {pipeline_mode = #tpu.pipeline_mode<synchronous>, transform_indices = @transform_4, window_bounds = array<i64: 1, 128>}, {transform_indices = @transform_5, window_bounds = array<i64: 16, 128>}]} {
    %c0 = arith.constant 0 : index
    %c0_0 = arith.constant 0 : index
    %0 = vector.load %arg1[%c0, %c0_0] : memref<16x128xf32, #tpu.memory_space<vmem>>, vector<16x128xf32>
    %cst = arith.constant 0.000000e+00 : f32
    %1 = vector.broadcast %cst : f32 to vector<16x128xf32>
    %c0_1 = arith.constant 0 : index
    %c0_2 = arith.constant 0 : index
    %2 = vector.load %arg2[%c0_1, %c0_2] : memref<128x128xf32, #tpu.memory_space<vmem>>, vector<128x128xf32>
    %cst_3 = arith.constant dense<0.000000e+00> : vector<16x128xf32>
    %3 = tpu.matmul %0, %2, %cst_3 {dimension_numbers = #tpu.dot_dimension_numbers<[1], [0], [0], [1], [0, 0, 1, 1], [], []>} : vector<16x128xf32>, vector<128x128xf32>, vector<16x128xf32> -> vector<16x128xf32>
    %c0_4 = arith.constant 0 : index
    %c0_5 = arith.constant 0 : index
    %4 = vector.load %arg3[%c0_4, %c0_5] : memref<1x128xf32, #tpu.memory_space<vmem>>, vector<1x128xf32>
    %5 = vector.broadcast %4 : vector<1x128xf32> to vector<16x128xf32>
    %6 = arith.addf %3, %5 : vector<16x128xf32>
    %cst_6 = arith.constant 5.000000e-01 : f32
    %7 = vector.broadcast %cst_6 : f32 to vector<16x128xf32>
    %8 = arith.mulf %7, %6 : vector<16x128xf32>
    %cst_7 = arith.constant 0.707106769 : f32
    %9 = vector.broadcast %cst_7 : f32 to vector<16x128xf32>
    %10 = arith.mulf %6, %9 : vector<16x128xf32>
    %11 = math.erf %10 : vector<16x128xf32>
    %cst_8 = arith.constant 1.000000e+00 : f32
    %12 = vector.broadcast %cst_8 : f32 to vector<16x128xf32>
    %13 = arith.addf %12, %11 : vector<16x128xf32>
    %14 = arith.mulf %8, %13 : vector<16x128xf32>
    %c0_9 = arith.constant 0 : index
    %c0_10 = arith.constant 0 : index
    %15 = vector.load %arg4[%c0_9, %c0_10] : memref<128x128xf32, #tpu.memory_space<vmem>>, vector<128x128xf32>
    %cst_11 = arith.constant dense<0.000000e+00> : vector<16x128xf32>
    %16 = tpu.matmul %14, %15, %cst_11 {dimension_numbers = #tpu.dot_dimension_numbers<[1], [0], [0], [1], [0, 0, 1, 1], [], []>} : vector<16x128xf32>, vector<128x128xf32>, vector<16x128xf32> -> vector<16x128xf32>
    %17 = arith.addf %1, %16 : vector<16x128xf32>
    %c0_12 = arith.constant 0 : index
    %c0_13 = arith.constant 0 : index
    %18 = vector.load %arg5[%c0_12, %c0_13] : memref<1x128xf32, #tpu.memory_space<vmem>>, vector<1x128xf32>
    %19 = vector.broadcast %18 : vector<1x128xf32> to vector<16x128xf32>
    %20 = arith.addf %17, %19 : vector<16x128xf32>
    %c0_14 = arith.constant 0 : index
    %c0_15 = arith.constant 0 : index
    %21 = vector.load %arg6[%c0_14, %c0_15] : memref<16x128xf32, #tpu.memory_space<vmem>>, vector<16x128xf32>
    tpu.vector_store %arg6[%c0_14, %c0_15], %20 {strides = array<i32>} : memref<16x128xf32, #tpu.memory_space<vmem>>, vector<16x128xf32>,
    return
  }
  func.func @transform_0(%arg0: i32) -> (i32, i32) {
    %c0_i32 = arith.constant 0 : i32
    %c0_i32_0 = arith.constant 0 : i32
    return %arg0, %c0_i32 : i32, i32
  }
  func.func @transform_1(%arg0: i32) -> (i32, i32) {
    %c0_i32 = arith.constant 0 : i32
    %c0_i32_0 = arith.constant 0 : i32
    %c0_i32_1 = arith.constant 0 : i32
    return %c0_i32, %c0_i32_0 : i32, i32
  }
  func.func @transform_2(%arg0: i32) -> (i32, i32) {
    %c0_i32 = arith.constant 0 : i32
    %c0_i32_0 = arith.constant 0 : i32
    %c0_i32_1 = arith.constant 0 : i32
    return %c0_i32, %c0_i32_0 : i32, i32
  }
  func.func @transform_3(%arg0: i32) -> (i32, i32) {
    %c0_i32 = arith.constant 0 : i32
    %c0_i32_0 = arith.constant 0 : i32
    %c0_i32_1 = arith.constant 0 : i32
    return %c0_i32, %c0_i32_0 : i32, i32
  }
  func.func @transform_4(%arg0: i32) -> (i32, i32) {
    %c0_i32 = arith.constant 0 : i32
    %c0_i32_0 = arith.constant 0 : i32
    %c0_i32_1 = arith.constant 0 : i32
    return %c0_i32, %c0_i32_0 : i32, i32
  }
  func.func @transform_5(%arg0: i32) -> (i32, i32) {
    %c0_i32 = arith.constant 0 : i32
    %c0_i32_0 = arith.constant 0 : i32
    return %arg0, %c0_i32 : i32, i32
  }
}

</mosaic_0001>

<bundles_post_ra>
// kernel: mlp_block.1
= control target key start
LH: loop header
LB: loop body
LE: loop exit
PB: predicated region body
PF: predicated region fallthrough
CT: control target
= control target key end

     0   :  { %s554_s1 = inlined_call_operand.vmem [shape: f32[128,128], index: 1, kind: input, shape index: {}]   ;;  %s555_s0 = inlined_call_operand.vmem [shape: f32[16,128], index: 0, kind: input, shape index: {}]   ;;  %s556_s3 = inlined_call_operand.vmem [shape: f32[128,128], index: 3, kind: input, shape index: {}]   ;;  %s557_s2 = inlined_call_operand.vmem [shape: f32[1,128], index: 2, kind: input, shape index: {}]   ;;  %s558_s4 = inlined_call_operand.vmem [shape: f32[1,128], index: 4, kind: input, shape index: {}]   ;;  %s559_s5 = inlined_call_operand.vmem [shape: f32[16,128], index: 5, kind: output, shape index: {}]  }
   0x1   :  { %v22_v0 = vld [vmem:[%s554_s1] sm:$0xff]  ;;  %v23_v1 = vld [vmem:[%s554_s1 + $0x8] sm:$0xff]  ;;  %v24_v2 = vld [vmem:[%s554_s1 + $0x10] sm:$0xff] }
   0x2   :  { %v342_v3 = vpack.c.bf16 %v23_v1, %v22_v0  ;;  %v25_v4 = vld [vmem:[%s554_s1 + $0x18] sm:$0xff]  ;;  %v26_v6 = vld [vmem:[%s554_s1 + $0x20] sm:$0xff]  ;;  %v27_v7 = vld [vmem:[%s554_s1 + $0x28] sm:$0xff] }
   0x3   :  { %v346_v5 = vpack.c.bf16 %v25_v4, %v24_v2  ;;  %v350_v8 = vpack.c.bf16 %v27_v7, %v26_v6  ;;  %v28_v9 = vld [vmem:[%s554_s1 + $0x30] sm:$0xff]  ;;  %v29_v10 = vld [vmem:[%s554_s1 + $0x38] sm:$0xff]  ;;  %v20_v11 = vld [vmem:[%s555_s0] sm:$0xff] }
   0x4   :  { %343 = vmatprep.subr.bf16.mxu0 %v342_v3  ;;  %304 = vmatprep.mubr.f32.mxu0 %v20_v11  ;;  %v130_v12 = vld [vmem:[%s556_s3] sm:$0xff]  ;;  %v131_v13 = vld [vmem:[%s556_s3 + $0x8] sm:$0xff]  ;;  %v132_v14 = vld [vmem:[%s556_s3 + $0x10] sm:$0xff]  ;;  %v354_v20 = vpack.c.bf16 %v29_v10, %v28_v9 }
   0x5   :  { %345 = vmatpush3.bf16.msra.mxu0 %v342_v3  ;;  %v374_v15 = vpack.c.bf16 %v131_v13, %v130_v12  ;;  %v133_v16 = vld [vmem:[%s556_s3 + $0x18] sm:$0xff]  ;;  %v134_v18 = vld [vmem:[%s556_s3 + $0x20] sm:$0xff]  ;;  %v135_v19 = vld [vmem:[%s556_s3 + $0x28] sm:$0xff] }
   0x6   :  { %347 = vmatprep.subr.bf16.mxu0 %v346_v5  ;;  %v378_v17 = vpack.c.bf16 %v133_v16, %v132_v14  ;;  %v30_v21 = vld [vmem:[%s554_s1 + $0x40] sm:$0xff]  ;;  %v31_v22 = vld [vmem:[%s554_s1 + $0x48] sm:$0xff]  ;;  %v382_v23 = vpack.c.bf16 %v135_v19, %v134_v18  ;;  %v32_v25 = vld [vmem:[%s554_s1 + $0x50] sm:$0xff] }
   0x7   :  { %375 = vmatprep.subr.bf16.mxu1 %v374_v15  ;;  %v358_v24 = vpack.c.bf16 %v31_v22, %v30_v21  ;;  %v33_v26 = vld [vmem:[%s554_s1 + $0x58] sm:$0xff]  ;;  %v34_v28 = vld [vmem:[%s554_s1 + $0x60] sm:$0xff]  ;;  %v35_v29 = vld [vmem:[%s554_s1 + $0x68] sm:$0xff] }
   0x8   :  { %377 = vmatpush3.bf16.msra.mxu1 %v374_v15  ;;  %v362_v27 = vpack.c.bf16 %v33_v26, %v32_v25  ;;  %v366_v30 = vpack.c.bf16 %v35_v29, %v34_v28  ;;  %v36_v31 = vld [vmem:[%s554_s1 + $0x70] sm:$0xff]  ;;  %v37_v32 = vld [vmem:[%s554_s1 + $0x78] sm:$0xff]  ;;  %v21_v34 = vld [vmem:[%s555_s0 + $0x8] sm:$0xff] }
   0x9   :  { %349 = vmatpush3.bf16.msra.mxu0 %v346_v5  ;;  %379 = vmatprep.subr.bf16.mxu1 %v378_v17  ;;  %v370_v33 = vpack.c.bf16 %v37_v32, %v36_v31  ;;  %v136_v35 = vld [vmem:[%s556_s3 + $0x30] sm:$0xff]  ;;  %v137_v36 = vld [vmem:[%s556_s3 + $0x38] sm:$0xff]  ;;  %v138_v38 = vld [vmem:[%s556_s3 + $0x40] sm:$0xff] }
   0xa   :  { %351 = vmatprep.subr.bf16.mxu0 %v350_v8  ;;  %v386_v37 = vpack.c.bf16 %v137_v36, %v136_v35  ;;  %v139_v39 = vld [vmem:[%s556_s3 + $0x48] sm:$0xff]  ;;  %v140_v41 = vld [vmem:[%s556_s3 + $0x50] sm:$0xff]  ;;  %v141_v42 = vld [vmem:[%s556_s3 + $0x58] sm:$0xff] }
   0xb   :  { %v390_v40 = vpack.c.bf16 %v139_v39, %v138_v38  ;;  %v394_v43 = vpack.c.bf16 %v141_v42, %v140_v41  ;;  %v142_v44 = vld [vmem:[%s556_s3 + $0x60] sm:$0xff]  ;;  %v143_v45 = vld [vmem:[%s556_s3 + $0x68] sm:$0xff]  ;;  %v144_v47 = vld [vmem:[%s556_s3 + $0x70] sm:$0xff] }
   0xc   :  { %381 = vmatpush3.bf16.msra.mxu1 %v378_v17  ;;  %v398_v46 = vpack.c.bf16 %v143_v45, %v142_v44  ;;  %v145_v48 = vld [vmem:[%s556_s3 + $0x78] sm:$0xff]  ;;  %v234_v50 = vld [vmem:[%s557_s2] ss:$0 sm:$0xff] }
   0xd   :  { %353 = vmatpush3.bf16.msra.mxu0 %v350_v8  ;;  %383 = vmatprep.subr.bf16.mxu1 %v382_v23  ;;  %v402_v49 = vpack.c.bf16 %v145_v48, %v144_v47  ;;  %v235_v1 = vld [vmem:[%s558_s4] ss:$0 sm:$0xff] }
   0xe   :  { %355 = vmatprep.subr.bf16.mxu0 %v354_v20 }
  0x10   :  { %385 = vmatpush3.bf16.msra.mxu1 %v382_v23 }
  0x11   :  { %357 = vmatpush3.bf16.msra.mxu0 %v354_v20  ;;  %387 = vmatprep.subr.bf16.mxu1 %v386_v37 }
  0x12   :  { %359 = vmatprep.subr.bf16.mxu0 %v358_v24 }
  0x14   :  { %389 = vmatpush3.bf16.msra.mxu1 %v386_v37 }
  0x15   :  { %361 = vmatpush3.bf16.msra.mxu0 %v358_v24  ;;  %391 = vmatprep.subr.bf16.mxu1 %v390_v40 }
  0x16   :  { %363 = vmatprep.subr.bf16.mxu0 %v362_v27 }
  0x18   :  { %393 = vmatpush3.bf16.msra.mxu1 %v390_v40 }
  0x19   :  { %365 = vmatpush3.bf16.msra.mxu0 %v362_v27  ;;  %395 = vmatprep.subr.bf16.mxu1 %v394_v43 }
  0x1a   :  { %367 = vmatprep.subr.bf16.mxu0 %v366_v30 }
  0x1c   :  { %397 = vmatpush3.bf16.msra.mxu1 %v394_v43 }
  0x1d   :  { %369 = vmatpush3.bf16.msra.mxu0 %v366_v30  ;;  %399 = vmatprep.subr.bf16.mxu1 %v398_v46 }
  0x1e   :  { %371 = vmatprep.subr.bf16.mxu0 %v370_v33 }
  0x20   :  { %401 = vmatpush3.bf16.msra.mxu1 %v398_v46 }
  0x21   :  { %373 = vmatpush3.bf16.msra.mxu0 %v370_v33  ;;  %403 = vmatprep.subr.bf16.mxu1 %v402_v49 }
  0x24   :  { %305 = vmatmul.mubr.f32.vlgmr.msra.gmra.mrb[0].mxu0 %v21_v34  ;;  %405 = vmatpush3.bf16.msra.mxu1 %v402_v49 }
  0xf7   :  { %v306_v51 = vpop.f32.mrb[0].mxu0 }
  0xf8   :  { %v117_v52 = vadd.f32 %v306_v51, %v234_v50  ;;  %v111_v53 = vpop.f32.mrb[1].mxu0 }
  0xf9   :  { %v112_v54 = vadd.f32 %v234_v50, %v111_v53 }
  0xfa   :  { %v123_v55 = vmul.f32 0.70710677, %v117_v52  ;;  %v121_v62 = vmul.f32 0.5, %v117_v52 }
  0xfb   :  { %v122_v56 = vmul.f32 0.70710677, %v112_v54  ;;  %v120_v60 = vmul.f32 0.5, %v112_v54 }
  0xfc   :  { %406 = verf.f32 %v123_v55 }
  0xfd   :  { %408 = verf.f32 %v122_v56 }
 0x106   :  { %v407_v57 = vpop.eup %406 }
 0x107   :  { %v409_v58 = vpop.eup %408  ;;  %v127_v59 = vadd.f32 1.0, %v407_v57 }
 0x108   :  { %v126_v61 = vadd.f32 1.0, %v409_v58 }
 0x109   :  { %v129_v0 = vmul.f32 %v127_v59, %v121_v62 }
 0x10a   :  { %v128_v63 = vmul.f32 %v126_v61, %v120_v60 }
 0x10c   :  { %339 = vmatprep.mubr.f32.mxu1 %v128_v63 }
 0x10d   :  { %340 = vmatmul.mubr.f32.vlgmr.msra.gmra.mrb[0].mxu1 %v129_v0 }
 0x1e0   :  { %v341_v2 = vpop.f32.mrb[0].mxu1 }
 0x1e1   :  { %v225_v3 = vadd.f32 %v341_v2, %v235_v1  ;;  %v219_v4 = vpop.f32.mrb[1].mxu1 }
 0x1e2   :  { %v220_v5 = vadd.f32 %v235_v1, %v219_v4 }
 0x1e3   :  { %229 = vst [vmem:[%s559_s5 + $0x8] sm:$0xff] %v225_v3 }
 0x1e4   :  { %228 = vst [vmem:[%s559_s5] sm:$0xff] %v220_v5 }

// kernel: mlp_block.1
= control target key start
LH: loop header
LB: loop body
LE: loop exit
PB: predicated region body
PF: predicated region fallthrough
CT: control target
= control target key end

     0   :  { %s554_s1 = inlined_call_operand.vmem [shape: f32[128,128], index: 1, kind: input, shape index: {}]   ;;  %s555_s0 = inlined_call_operand.vmem [shape: f32[16,128], index: 0, kind: input, shape index: {}]   ;;  %s556_s3 = inlined_call_operand.vmem [shape: f32[128,128], index: 3, kind: input, shape index: {}]   ;;  %s557_s2 = inlined_call_operand.vmem [shape: f32[1,128], index: 2, kind: input, shape index: {}]   ;;  %s558_s4 = inlined_call_operand.vmem [shape: f32[1,128], index: 4, kind: input, shape index: {}]   ;;  %s559_s5 = inlined_call_operand.vmem [shape: f32[16,128], index: 5, kind: output, shape index: {}]  }
   0x1   :  { %v22_v0 = vld [vmem:[%s554_s1] sm:$0xff]  ;;  %v23_v1 = vld [vmem:[%s554_s1 + $0x8] sm:$0xff]  ;;  %v24_v2 = vld [vmem:[%s554_s1 + $0x10] sm:$0xff] }
   0x2   :  { %v342_v3 = vpack.c.bf16 %v23_v1, %v22_v0  ;;  %v25_v4 = vld [vmem:[%s554_s1 + $0x18] sm:$0xff]  ;;  %v26_v6 = vld [vmem:[%s554_s1 + $0x20] sm:$0xff]  ;;  %v27_v7 = vld [vmem:[%s554_s1 + $0x28] sm:$0xff] }
   0x3   :  { %v346_v5 = vpack.c.bf16 %v25_v4, %v24_v2  ;;  %v350_v8 = vpack.c.bf16 %v27_v7, %v26_v6  ;;  %v28_v9 = vld [vmem:[%s554_s1 + $0x30] sm:$0xff]  ;;  %v29_v10 = vld [vmem:[%s554_s1 + $0x38] sm:$0xff]  ;;  %v20_v11 = vld [vmem:[%s555_s0] sm:$0xff] }
   0x4   :  { %343 = vmatprep.subr.bf16.mxu0 %v342_v3  ;;  %304 = vmatprep.mubr.f32.mxu0 %v20_v11  ;;  %v130_v12 = vld [vmem:[%s556_s3] sm:$0xff]  ;;  %v131_v13 = vld [vmem:[%s556_s3 + $0x8] sm:$0xff]  ;;  %v132_v14 = vld [vmem:[%s556_s3 + $0x10] sm:$0xff]  ;;  %v354_v20 = vpack.c.bf16 %v29_v10, %v28_v9 }
   0x5   :  { %345 = vmatpush3.bf16.msra.mxu0 %v342_v3  ;;  %v374_v15 = vpack.c.bf16 %v131_v13, %v130_v12  ;;  %v133_v16 = vld [vmem:[%s556_s3 + $0x18] sm:$0xff]  ;;  %v134_v18 = vld [vmem:[%s556_s3 + $0x20] sm:$0xff]  ;;  %v135_v19 = vld [vmem:[%s556_s3 + $0x28] sm:$0xff] }
   0x6   :  { %347 = vmatprep.subr.bf16.mxu0 %v346_v5  ;;  %v378_v17 = vpack.c.bf16 %v133_v16, %v132_v14  ;;  %v30_v21 = vld [vmem:[%s554_s1 + $0x40] sm:$0xff]  ;;  %v31_v22 = vld [vmem:[%s554_s1 + $0x48] sm:$0xff]  ;;  %v382_v23 = vpack.c.bf16 %v135_v19, %v134_v18  ;;  %v32_v25 = vld [vmem:[%s554_s1 + $0x50] sm:$0xff] }
   0x7   :  { %375 = vmatprep.subr.bf16.mxu1 %v374_v15  ;;  %v358_v24 = vpack.c.bf16 %v31_v22, %v30_v21  ;;  %v33_v26 = vld [vmem:[%s554_s1 + $0x58] sm:$0xff]  ;;  %v34_v28 = vld [vmem:[%s554_s1 + $0x60] sm:$0xff]  ;;  %v35_v29 = vld [vmem:[%s554_s1 + $0x68] sm:$0xff] }
   0x8   :  { %377 = vmatpush3.bf16.msra.mxu1 %v374_v15  ;;  %v362_v27 = vpack.c.bf16 %v33_v26, %v32_v25  ;;  %v366_v30 = vpack.c.bf16 %v35_v29, %v34_v28  ;;  %v36_v31 = vld [vmem:[%s554_s1 + $0x70] sm:$0xff]  ;;  %v37_v32 = vld [vmem:[%s554_s1 + $0x78] sm:$0xff]  ;;  %v21_v34 = vld [vmem:[%s555_s0 + $0x8] sm:$0xff] }
   0x9   :  { %349 = vmatpush3.bf16.msra.mxu0 %v346_v5  ;;  %379 = vmatprep.subr.bf16.mxu1 %v378_v17  ;;  %v370_v33 = vpack.c.bf16 %v37_v32, %v36_v31  ;;  %v136_v35 = vld [vmem:[%s556_s3 + $0x30] sm:$0xff]  ;;  %v137_v36 = vld [vmem:[%s556_s3 + $0x38] sm:$0xff]  ;;  %v138_v38 = vld [vmem:[%s556_s3 + $0x40] sm:$0xff] }
   0xa   :  { %351 = vmatprep.subr.bf16.mxu0 %v350_v8  ;;  %v386_v37 = vpack.c.bf16 %v137_v36, %v136_v35  ;;  %v139_v39 = vld [vmem:[%s556_s3 + $0x48] sm:$0xff]  ;;  %v140_v41 = vld [vmem:[%s556_s3 + $0x50] sm:$0xff]  ;;  %v141_v42 = vld [vmem:[%s556_s3 + $0x58] sm:$0xff] }
   0xb   :  { %v390_v40 = vpack.c.bf16 %v139_v39, %v138_v38  ;;  %v394_v43 = vpack.c.bf16 %v141_v42, %v140_v41  ;;  %v142_v44 = vld [vmem:[%s556_s3 + $0x60] sm:$0xff]  ;;  %v143_v45 = vld [vmem:[%s556_s3 + $0x68] sm:$0xff]  ;;  %v144_v47 = vld [vmem:[%s556_s3 + $0x70] sm:$0xff] }
   0xc   :  { %381 = vmatpush3.bf16.msra.mxu1 %v378_v17  ;;  %v398_v46 = vpack.c.bf16 %v143_v45, %v142_v44  ;;  %v145_v48 = vld [vmem:[%s556_s3 + $0x78] sm:$0xff]  ;;  %v234_v50 = vld [vmem:[%s557_s2] ss:$0 sm:$0xff] }
   0xd   :  { %353 = vmatpush3.bf16.msra.mxu0 %v350_v8  ;;  %383 = vmatprep.subr.bf16.mxu1 %v382_v23  ;;  %v402_v49 = vpack.c.bf16 %v145_v48, %v144_v47  ;;  %v235_v1 = vld [vmem:[%s558_s4] ss:$0 sm:$0xff] }
   0xe   :  { %355 = vmatprep.subr.bf16.mxu0 %v354_v20 }
  0x10   :  { %385 = vmatpush3.bf16.msra.mxu1 %v382_v23 }
  0x11   :  { %357 = vmatpush3.bf16.msra.mxu0 %v354_v20  ;;  %387 = vmatprep.subr.bf16.mxu1 %v386_v37 }
  0x12   :  { %359 = vmatprep.subr.bf16.mxu0 %v358_v24 }
  0x14   :  { %389 = vmatpush3.bf16.msra.mxu1 %v386_v37 }
  0x15   :  { %361 = vmatpush3.bf16.msra.mxu0 %v358_v24  ;;  %391 = vmatprep.subr.bf16.mxu1 %v390_v40 }
  0x16   :  { %363 = vmatprep.subr.bf16.mxu0 %v362_v27 }
  0x18   :  { %393 = vmatpush3.bf16.msra.mxu1 %v390_v40 }
  0x19   :  { %365 = vmatpush3.bf16.msra.mxu0 %v362_v27  ;;  %395 = vmatprep.subr.bf16.mxu1 %v394_v43 }
  0x1a   :  { %367 = vmatprep.subr.bf16.mxu0 %v366_v30 }
  0x1c   :  { %397 = vmatpush3.bf16.msra.mxu1 %v394_v43 }
  0x1d   :  { %369 = vmatpush3.bf16.msra.mxu0 %v366_v30  ;;  %399 = vmatprep.subr.bf16.mxu1 %v398_v46 }
  0x1e   :  { %371 = vmatprep.subr.bf16.mxu0 %v370_v33 }
  0x20   :  { %401 = vmatpush3.bf16.msra.mxu1 %v398_v46 }
  0x21   :  { %373 = vmatpush3.bf16.msra.mxu0 %v370_v33  ;;  %403 = vmatprep.subr.bf16.mxu1 %v402_v49 }
  0x24   :  { %305 = vmatmul.mubr.f32.vlgmr.msra.gmra.mrb[0].mxu0 %v21_v34  ;;  %405 = vmatpush3.bf16.msra.mxu1 %v402_v49 }
  0xf7   :  { %v306_v51 = vpop.f32.mrb[0].mxu0 }
  0xf8   :  { %v117_v52 = vadd.f32 %v306_v51, %v234_v50  ;;  %v111_v53 = vpop.f32.mrb[1].mxu0 }
  0xf9   :  { %v112_v54 = vadd.f32 %v234_v50, %v111_v53 }
  0xfa   :  { %v123_v55 = vmul.f32 0.70710677, %v117_v52  ;;  %v121_v62 = vmul.f32 0.5, %v117_v52 }
  0xfb   :  { %v122_v56 = vmul.f32 0.70710677, %v112_v54  ;;  %v120_v60 = vmul.f32 0.5, %v112_v54 }
  0xfc   :  { %406 = verf.f32 %v123_v55 }
  0xfd   :  { %408 = verf.f32 %v122_v56 }
 0x106   :  { %v407_v57 = vpop.eup %406 }
 0x107   :  { %v409_v58 = vpop.eup %408  ;;  %v127_v59 = vadd.f32 1.0, %v407_v57 }
 0x108   :  { %v126_v61 = vadd.f32 1.0, %v409_v58 }
 0x109   :  { %v129_v0 = vmul.f32 %v127_v59, %v121_v62 }
 0x10a   :  { %v128_v63 = vmul.f32 %v126_v61, %v120_v60 }
 0x10c   :  { %339 = vmatprep.mubr.f32.mxu1 %v128_v63 }
 0x10d   :  { %340 = vmatmul.mubr.f32.vlgmr.msra.gmra.mrb[0].mxu1 %v129_v0 }
 0x1e0   :  { %v341_v2 = vpop.f32.mrb[0].mxu1 }
 0x1e1   :  { %v225_v3 = vadd.f32 %v341_v2, %v235_v1  ;;  %v219_v4 = vpop.f32.mrb[1].mxu1 }
 0x1e2   :  { %v220_v5 = vadd.f32 %v235_v1, %v219_v4 }
 0x1e3   :  { %229 = vst [vmem:[%s559_s5 + $0x8] sm:$0xff] %v225_v3 }
 0x1e4   :  { %228 = vst [vmem:[%s559_s5] sm:$0xff] %v220_v5 }

</bundles_post_ra>
